<compile_context>
chip_gen: v7x
topology: tpu7x:2x2x1
jax: 0.10.0
libtpu: 0.0.40
codegen_flags: <defaults>
</compile_context>

<pallas_src>
import jax
import jax.numpy as jnp
from jax.experimental import pallas as pl
from jax.experimental.pallas import tpu as pltpu


def fused_rnn_kernel(x_ref, wt_ref, wb_ref, ut_ref, ub_ref, out_ref, tfin_ref):
    """Fused input projection + tanh-RNN recurrence, one grid step.

    x_ref   : (B*S, E)  pre-embedded inputs, batch-major contiguous rows
    wt_ref  : (E, H)    W.weight.T
    wb_ref  : (1, H)    W.bias
    ut_ref  : (H, H)    U.weight.T
    ub_ref  : (1, H)    U.bias
    out_ref : (B, S*H)  lane-dense output slab; column block i*H:(i+1)*H is the
                        hidden state after timestep i
    tfin_ref: (B, H)    final hidden state (== last column block of out_ref)
    """
    BS, E = x_ref.shape
    B, H = tfin_ref.shape
    S = BS // B

    # --- Hoisted input projection: one (B*S, E) @ (E, H) MXU matmul for the
    # whole sequence (it does not depend on the carry). ---
    h1_2d = (
        jnp.dot(x_ref[...], wt_ref[...], preferred_element_type=jnp.float32)
        + wb_ref[...]
    )
    # Row b*S + s  ->  [b, s, :].  Lane dim (H) unchanged, second-minor split is
    # 8-sublane aligned here, so this is just a vreg regrouping.
    h1 = h1_2d.reshape(B, S, H)

    ut = ut_ref[...]
    ub = ub_ref[...]

    # --- Sequential recurrence, statically unrolled (S small and fixed) so the
    # scheduler sees the whole chain; only tanh + the (B,H)@(H,H) matmul sit on
    # the serial path. ---
    t = jnp.zeros((B, H), jnp.float32)
    for i in range(S):
        h3 = jnp.tanh(h1[:, i, :] + t)
        t = jnp.dot(h3, ut, preferred_element_type=jnp.float32) + ub
        out_ref[:, i * H:(i + 1) * H] = t   # static slice into lane-dense slab

    tfin_ref[...] = t


@jax.jit
def my_rnn_forward(x_bse, W_w, W_b, U_w, U_b):
    """x_bse: (B, S, E); W_w: (H, E); W_b: (H,); U_w: (H, H); U_b: (H,)."""
    B, S, E = x_bse.shape
    H = W_w.shape[0]

    x2d = x_bse.astype(jnp.float32).reshape(B * S, E)   # contiguous merge, free
    Wt = W_w.T.astype(jnp.float32)                       # (E, H)
    Ut = U_w.T.astype(jnp.float32)                       # (H, H)
    Wb = W_b.reshape(1, H).astype(jnp.float32)
    Ub = U_b.reshape(1, H).astype(jnp.float32)

    out_flat, t_final = pl.pallas_call(
        fused_rnn_kernel,
        out_shape=(
            jax.ShapeDtypeStruct((B, S * H), jnp.float32),
            jax.ShapeDtypeStruct((B, H), jnp.float32),
        ),
        grid_spec=pltpu.PrefetchScalarGridSpec(
            num_scalar_prefetch=0,
            grid=(1,),
            in_specs=[
                pl.BlockSpec((B * S, E), lambda i: (0, 0)),
                pl.BlockSpec((E, H), lambda i: (0, 0)),
                pl.BlockSpec((1, H), lambda i: (0, 0)),
                pl.BlockSpec((H, H), lambda i: (0, 0)),
                pl.BlockSpec((1, H), lambda i: (0, 0)),
            ],
            out_specs=[
                pl.BlockSpec((B, S * H), lambda i: (0, 0)),
                pl.BlockSpec((B, H), lambda i: (0, 0)),
            ],
        ),
        compiler_params=pltpu.CompilerParams(
            dimension_semantics=("arbitrary",),   # recurrence is sequential
        ),
    )(x2d, Wt, Wb, Ut, Ub)

    result1 = out_flat.reshape(B, S, H)   # trailing-dim split, no data movement
    return result1, t_final


def reference_forward(x_bse, W_w, W_b, U_w, U_b):
    """Pure-JAX reference matching the PyTorch loop."""
    B, S, E = x_bse.shape
    H = W_w.shape[0]
    t = jnp.zeros((B, H), jnp.float32)
    outs = []
    for i in range(S):
        h1 = x_bse[:, i] @ W_w.T + W_b
        h3 = jnp.tanh(h1 + t)
        t = h3 @ U_w.T + U_b
        outs.append(t)
    return jnp.stack(outs, axis=1), t


if __name__ == "__main__":
    # Small shapes consistent with the module: embed_num == input_size (dict_size).
    B, S, E, H = 2, 8, 32, 32

    key = jax.random.PRNGKey(0)
    k_x, k_ww, k_wb, k_uw, k_ub = jax.random.split(key, 5)

    x = jax.random.normal(k_x, (B, S, E), dtype=jnp.float32)
    # Deterministic synthetic parameters (not loading a checkpoint).
    W_w = 0.1 * jax.random.normal(k_ww, (H, E), dtype=jnp.float32)
    W_b = 0.1 * jax.random.normal(k_wb, (H,), dtype=jnp.float32)
    U_w = 0.1 * jax.random.normal(k_uw, (H, H), dtype=jnp.float32)
    U_b = 0.1 * jax.random.normal(k_ub, (H,), dtype=jnp.float32)

    result1, t_final = my_rnn_forward(x, W_w, W_b, U_w, U_b)
    jax.block_until_ready((result1, t_final))

    ref_res, ref_t = reference_forward(x, W_w, W_b, U_w, U_b)
    assert result1.shape == (B, S, H) and t_final.shape == (B, H)
    assert jnp.allclose(result1, ref_res, atol=1e-5, rtol=1e-5)
    assert jnp.allclose(t_final, ref_t, atol=1e-5, rtol=1e-5)

    print("KERNEL_OK")
</pallas_src>

<mosaic_0001>
module attributes {stable_mosaic.version = 11 : i64} {
  func.func @fused_rnn_kernel(%arg0: i32, %arg1: memref<16x32xf32, #tpu.memory_space<vmem>>, %arg2: memref<32x32xf32, #tpu.memory_space<vmem>>, %arg3: memref<1x32xf32, #tpu.memory_space<vmem>>, %arg4: memref<32x32xf32, #tpu.memory_space<vmem>>, %arg5: memref<1x32xf32, #tpu.memory_space<vmem>>, %arg6: memref<2x256xf32, #tpu.memory_space<vmem>>, %arg7: memref<2x32xf32, #tpu.memory_space<vmem>>) attributes {dimension_semantics = [#tpu.dimension_semantics<arbitrary>], iteration_bounds = array<i64: 1>, scalar_prefetch = 0 : i64, scratch_operands = 0 : i64, tpu.core_type = #tpu.core_type<tc>, window_params = [{pipeline_mode = #tpu.pipeline_mode<synchronous>, transform_indices = @transform_0, window_bounds = array<i64: 16, 32>}, {pipeline_mode = #tpu.pipeline_mode<synchronous>, transform_indices = @transform_1, window_bounds = array<i64: 32, 32>}, {pipeline_mode = #tpu.pipeline_mode<synchronous>, transform_indices = @transform_2, window_bounds = array<i64: 1, 32>}, {pipeline_mode = #tpu.pipeline_mode<synchronous>, transform_indices = @transform_3, window_bounds = array<i64: 32, 32>}, {pipeline_mode = #tpu.pipeline_mode<synchronous>, transform_indices = @transform_4, window_bounds = array<i64: 1, 32>}, {pipeline_mode = #tpu.pipeline_mode<synchronous>, transform_indices = @transform_5, window_bounds = array<i64: 2, 256>}, {pipeline_mode = #tpu.pipeline_mode<synchronous>, transform_indices = @transform_6, window_bounds = array<i64: 2, 32>}]} {
    %c0 = arith.constant 0 : index
    %c0_0 = arith.constant 0 : index
    %0 = vector.load %arg1[%c0, %c0_0] : memref<16x32xf32, #tpu.memory_space<vmem>>, vector<16x32xf32>
    %c0_1 = arith.constant 0 : index
    %c0_2 = arith.constant 0 : index
    %1 = vector.load %arg2[%c0_1, %c0_2] : memref<32x32xf32, #tpu.memory_space<vmem>>, vector<32x32xf32>
    %cst = arith.constant dense<0.000000e+00> : vector<16x32xf32>
    %2 = tpu.matmul %0, %1, %cst {dimension_numbers = #tpu.dot_dimension_numbers<[1], [0], [0], [1], [0, 0, 1, 1], [], []>} : vector<16x32xf32>, vector<32x32xf32>, vector<16x32xf32> -> vector<16x32xf32>
    %c0_3 = arith.constant 0 : index
    %c0_4 = arith.constant 0 : index
    %3 = vector.load %arg3[%c0_3, %c0_4] : memref<1x32xf32, #tpu.memory_space<vmem>>, vector<1x32xf32>
    %4 = vector.broadcast %3 : vector<1x32xf32> to vector<16x32xf32>
    %5 = arith.addf %2, %4 : vector<16x32xf32>
    %6 = vector.shape_cast %5 : vector<16x32xf32> to vector<2x8x32xf32>
    %c0_5 = arith.constant 0 : index
    %c0_6 = arith.constant 0 : index
    %7 = vector.load %arg4[%c0_5, %c0_6] : memref<32x32xf32, #tpu.memory_space<vmem>>, vector<32x32xf32>
    %c0_7 = arith.constant 0 : index
    %c0_8 = arith.constant 0 : index
    %8 = vector.load %arg5[%c0_7, %c0_8] : memref<1x32xf32, #tpu.memory_space<vmem>>, vector<1x32xf32>
    %cst_9 = arith.constant 0.000000e+00 : f32
    %9 = vector.broadcast %cst_9 : f32 to vector<2x32xf32>
    %10 = vector.extract_strided_slice %6 {offsets = [0, 0, 0], sizes = [2, 1, 32], strides = [1, 1, 1]} : vector<2x8x32xf32> to vector<2x1x32xf32>
    %11 = vector.shape_cast %10 : vector<2x1x32xf32> to vector<2x32xf32>
    %12 = arith.addf %11, %9 : vector<2x32xf32>
    %13 = math.tanh %12 : vector<2x32xf32>
    %cst_10 = arith.constant dense<0.000000e+00> : vector<2x32xf32>
    %14 = tpu.matmul %13, %7, %cst_10 {dimension_numbers = #tpu.dot_dimension_numbers<[1], [0], [0], [1], [0, 0, 1, 1], [], []>} : vector<2x32xf32>, vector<32x32xf32>, vector<2x32xf32> -> vector<2x32xf32>
    %15 = vector.broadcast %8 : vector<1x32xf32> to vector<2x32xf32>
    %16 = arith.addf %14, %15 : vector<2x32xf32>
    %c0_11 = arith.constant 0 : index
    %c0_12 = arith.constant 0 : index
    %17 = vector.load %arg6[%c0_11, %c0_12] : memref<2x256xf32, #tpu.memory_space<vmem>>, vector<2x32xf32>
    tpu.vector_store %arg6[%c0_11, %c0_12], %16 {strides = array<i32>} : memref<2x256xf32, #tpu.memory_space<vmem>>, vector<2x32xf32>,
    %18 = vector.extract_strided_slice %6 {offsets = [0, 1, 0], sizes = [2, 1, 32], strides = [1, 1, 1]} : vector<2x8x32xf32> to vector<2x1x32xf32>
    %19 = vector.shape_cast %18 : vector<2x1x32xf32> to vector<2x32xf32>
    %20 = arith.addf %19, %16 : vector<2x32xf32>
    %21 = math.tanh %20 : vector<2x32xf32>
    %cst_13 = arith.constant dense<0.000000e+00> : vector<2x32xf32>
    %22 = tpu.matmul %21, %7, %cst_13 {dimension_numbers = #tpu.dot_dimension_numbers<[1], [0], [0], [1], [0, 0, 1, 1], [], []>} : vector<2x32xf32>, vector<32x32xf32>, vector<2x32xf32> -> vector<2x32xf32>
    %23 = vector.broadcast %8 : vector<1x32xf32> to vector<2x32xf32>
    %24 = arith.addf %22, %23 : vector<2x32xf32>
    %c0_14 = arith.constant 0 : index
    %c32 = arith.constant 32 : index
    %25 = vector.load %arg6[%c0_14, %c32] : memref<2x256xf32, #tpu.memory_space<vmem>>, vector<2x32xf32>
    tpu.vector_store %arg6[%c0_14, %c32], %24 {strides = array<i32>} : memref<2x256xf32, #tpu.memory_space<vmem>>, vector<2x32xf32>,
    %26 = vector.extract_strided_slice %6 {offsets = [0, 2, 0], sizes = [2, 1, 32], strides = [1, 1, 1]} : vector<2x8x32xf32> to vector<2x1x32xf32>
    %27 = vector.shape_cast %26 : vector<2x1x32xf32> to vector<2x32xf32>
    %28 = arith.addf %27, %24 : vector<2x32xf32>
    %29 = math.tanh %28 : vector<2x32xf32>
    %cst_15 = arith.constant dense<0.000000e+00> : vector<2x32xf32>
    %30 = tpu.matmul %29, %7, %cst_15 {dimension_numbers = #tpu.dot_dimension_numbers<[1], [0], [0], [1], [0, 0, 1, 1], [], []>} : vector<2x32xf32>, vector<32x32xf32>, vector<2x32xf32> -> vector<2x32xf32>
    %31 = vector.broadcast %8 : vector<1x32xf32> to vector<2x32xf32>
    %32 = arith.addf %30, %31 : vector<2x32xf32>
    %c0_16 = arith.constant 0 : index
    %c64 = arith.constant 64 : index
    %33 = vector.load %arg6[%c0_16, %c64] : memref<2x256xf32, #tpu.memory_space<vmem>>, vector<2x32xf32>
    tpu.vector_store %arg6[%c0_16, %c64], %32 {strides = array<i32>} : memref<2x256xf32, #tpu.memory_space<vmem>>, vector<2x32xf32>,
    %34 = vector.extract_strided_slice %6 {offsets = [0, 3, 0], sizes = [2, 1, 32], strides = [1, 1, 1]} : vector<2x8x32xf32> to vector<2x1x32xf32>
    %35 = vector.shape_cast %34 : vector<2x1x32xf32> to vector<2x32xf32>
    %36 = arith.addf %35, %32 : vector<2x32xf32>
    %37 = math.tanh %36 : vector<2x32xf32>
    %cst_17 = arith.constant dense<0.000000e+00> : vector<2x32xf32>
    %38 = tpu.matmul %37, %7, %cst_17 {dimension_numbers = #tpu.dot_dimension_numbers<[1], [0], [0], [1], [0, 0, 1, 1], [], []>} : vector<2x32xf32>, vector<32x32xf32>, vector<2x32xf32> -> vector<2x32xf32>
    %39 = vector.broadcast %8 : vector<1x32xf32> to vector<2x32xf32>
    %40 = arith.addf %38, %39 : vector<2x32xf32>
    %c0_18 = arith.constant 0 : index
    %c96 = arith.constant 96 : index
    %41 = vector.load %arg6[%c0_18, %c96] : memref<2x256xf32, #tpu.memory_space<vmem>>, vector<2x32xf32>
    tpu.vector_store %arg6[%c0_18, %c96], %40 {strides = array<i32>} : memref<2x256xf32, #tpu.memory_space<vmem>>, vector<2x32xf32>,
    %42 = vector.extract_strided_slice %6 {offsets = [0, 4, 0], sizes = [2, 1, 32], strides = [1, 1, 1]} : vector<2x8x32xf32> to vector<2x1x32xf32>
    %43 = vector.shape_cast %42 : vector<2x1x32xf32> to vector<2x32xf32>
    %44 = arith.addf %43, %40 : vector<2x32xf32>
    %45 = math.tanh %44 : vector<2x32xf32>
    %cst_19 = arith.constant dense<0.000000e+00> : vector<2x32xf32>
    %46 = tpu.matmul %45, %7, %cst_19 {dimension_numbers = #tpu.dot_dimension_numbers<[1], [0], [0], [1], [0, 0, 1, 1], [], []>} : vector<2x32xf32>, vector<32x32xf32>, vector<2x32xf32> -> vector<2x32xf32>
    %47 = vector.broadcast %8 : vector<1x32xf32> to vector<2x32xf32>
    %48 = arith.addf %46, %47 : vector<2x32xf32>
    %c0_20 = arith.constant 0 : index
    %c128 = arith.constant 128 : index
    %49 = vector.load %arg6[%c0_20, %c128] : memref<2x256xf32, #tpu.memory_space<vmem>>, vector<2x32xf32>
    tpu.vector_store %arg6[%c0_20, %c128], %48 {strides = array<i32>} : memref<2x256xf32, #tpu.memory_space<vmem>>, vector<2x32xf32>,
    %50 = vector.extract_strided_slice %6 {offsets = [0, 5, 0], sizes = [2, 1, 32], strides = [1, 1, 1]} : vector<2x8x32xf32> to vector<2x1x32xf32>
    %51 = vector.shape_cast %50 : vector<2x1x32xf32> to vector<2x32xf32>
    %52 = arith.addf %51, %48 : vector<2x32xf32>
    %53 = math.tanh %52 : vector<2x32xf32>
    %cst_21 = arith.constant dense<0.000000e+00> : vector<2x32xf32>
    %54 = tpu.matmul %53, %7, %cst_21 {dimension_numbers = #tpu.dot_dimension_numbers<[1], [0], [0], [1], [0, 0, 1, 1], [], []>} : vector<2x32xf32>, vector<32x32xf32>, vector<2x32xf32> -> vector<2x32xf32>
    %55 = vector.broadcast %8 : vector<1x32xf32> to vector<2x32xf32>
    %56 = arith.addf %54, %55 : vector<2x32xf32>
    %c0_22 = arith.constant 0 : index
    %c160 = arith.constant 160 : index
    %57 = vector.load %arg6[%c0_22, %c160] : memref<2x256xf32, #tpu.memory_space<vmem>>, vector<2x32xf32>
    tpu.vector_store %arg6[%c0_22, %c160], %56 {strides = array<i32>} : memref<2x256xf32, #tpu.memory_space<vmem>>, vector<2x32xf32>,
    %58 = vector.extract_strided_slice %6 {offsets = [0, 6, 0], sizes = [2, 1, 32], strides = [1, 1, 1]} : vector<2x8x32xf32> to vector<2x1x32xf32>
    %59 = vector.shape_cast %58 : vector<2x1x32xf32> to vector<2x32xf32>
    %60 = arith.addf %59, %56 : vector<2x32xf32>
    %61 = math.tanh %60 : vector<2x32xf32>
    %cst_23 = arith.constant dense<0.000000e+00> : vector<2x32xf32>
    %62 = tpu.matmul %61, %7, %cst_23 {dimension_numbers = #tpu.dot_dimension_numbers<[1], [0], [0], [1], [0, 0, 1, 1], [], []>} : vector<2x32xf32>, vector<32x32xf32>, vector<2x32xf32> -> vector<2x32xf32>
    %63 = vector.broadcast %8 : vector<1x32xf32> to vector<2x32xf32>
    %64 = arith.addf %62, %63 : vector<2x32xf32>
    %c0_24 = arith.constant 0 : index
    %c192 = arith.constant 192 : index
    %65 = vector.load %arg6[%c0_24, %c192] : memref<2x256xf32, #tpu.memory_space<vmem>>, vector<2x32xf32>
    tpu.vector_store %arg6[%c0_24, %c192], %64 {strides = array<i32>} : memref<2x256xf32, #tpu.memory_space<vmem>>, vector<2x32xf32>,
    %66 = vector.extract_strided_slice %6 {offsets = [0, 7, 0], sizes = [2, 1, 32], strides = [1, 1, 1]} : vector<2x8x32xf32> to vector<2x1x32xf32>
    %67 = vector.shape_cast %66 : vector<2x1x32xf32> to vector<2x32xf32>
    %68 = arith.addf %67, %64 : vector<2x32xf32>
    %69 = math.tanh %68 : vector<2x32xf32>
    %cst_25 = arith.constant dense<0.000000e+00> : vector<2x32xf32>
    %70 = tpu.matmul %69, %7, %cst_25 {dimension_numbers = #tpu.dot_dimension_numbers<[1], [0], [0], [1], [0, 0, 1, 1], [], []>} : vector<2x32xf32>, vector<32x32xf32>, vector<2x32xf32> -> vector<2x32xf32>
    %71 = vector.broadcast %8 : vector<1x32xf32> to vector<2x32xf32>
    %72 = arith.addf %70, %71 : vector<2x32xf32>
    %c0_26 = arith.constant 0 : index
    %c224 = arith.constant 224 : index
    %73 = vector.load %arg6[%c0_26, %c224] : memref<2x256xf32, #tpu.memory_space<vmem>>, vector<2x32xf32>
    tpu.vector_store %arg6[%c0_26, %c224], %72 {strides = array<i32>} : memref<2x256xf32, #tpu.memory_space<vmem>>, vector<2x32xf32>,
    %c0_27 = arith.constant 0 : index
    %c0_28 = arith.constant 0 : index
    %74 = vector.load %arg7[%c0_27, %c0_28] : memref<2x32xf32, #tpu.memory_space<vmem>>, vector<2x32xf32>
    tpu.vector_store %arg7[%c0_27, %c0_28], %72 {strides = array<i32>} : memref<2x32xf32, #tpu.memory_space<vmem>>, vector<2x32xf32>,
    return
  }
  func.func @transform_0(%arg0: i32) -> (i32, i32) {
    %c0_i32 = arith.constant 0 : i32
    %c0_i32_0 = arith.constant 0 : i32
    %c0_i32_1 = arith.constant 0 : i32
    return %c0_i32, %c0_i32_0 : i32, i32
  }
  func.func @transform_1(%arg0: i32) -> (i32, i32) {
    %c0_i32 = arith.constant 0 : i32
    %c0_i32_0 = arith.constant 0 : i32
    %c0_i32_1 = arith.constant 0 : i32
    return %c0_i32, %c0_i32_0 : i32, i32
  }
  func.func @transform_2(%arg0: i32) -> (i32, i32) {
    %c0_i32 = arith.constant 0 : i32
    %c0_i32_0 = arith.constant 0 : i32
    %c0_i32_1 = arith.constant 0 : i32
    return %c0_i32, %c0_i32_0 : i32, i32
  }
  func.func @transform_3(%arg0: i32) -> (i32, i32) {
    %c0_i32 = arith.constant 0 : i32
    %c0_i32_0 = arith.constant 0 : i32
    %c0_i32_1 = arith.constant 0 : i32
    return %c0_i32, %c0_i32_0 : i32, i32
  }
  func.func @transform_4(%arg0: i32) -> (i32, i32) {
    %c0_i32 = arith.constant 0 : i32
    %c0_i32_0 = arith.constant 0 : i32
    %c0_i32_1 = arith.constant 0 : i32
    return %c0_i32, %c0_i32_0 : i32, i32
  }
  func.func @transform_5(%arg0: i32) -> (i32, i32) {
    %c0_i32 = arith.constant 0 : i32
    %c0_i32_0 = arith.constant 0 : i32
    %c0_i32_1 = arith.constant 0 : i32
    return %c0_i32, %c0_i32_0 : i32, i32
  }
  func.func @transform_6(%arg0: i32) -> (i32, i32) {
    %c0_i32 = arith.constant 0 : i32
    %c0_i32_0 = arith.constant 0 : i32
    %c0_i32_1 = arith.constant 0 : i32
    return %c0_i32, %c0_i32_0 : i32, i32
  }
}

</mosaic_0001>

<bundles_post_ra>
// kernel: my_rnn_forward.1
= control target key start
LH: loop header
LB: loop body
LE: loop exit
PB: predicated region body
PF: predicated region fallthrough
CT: control target
= control target key end

     0   :  { %vm36_vm0 = vcmask 261120   ;;  %s1417_s0 = inlined_call_operand.vmem [shape: f32[16,32], index: 0, kind: input, shape index: {}]   ;;  %s1418_s1 = inlined_call_operand.vmem [shape: f32[32,32], index: 1, kind: input, shape index: {}]   ;;  %s1419_s2 = inlined_call_operand.vmem [shape: f32[1,32], index: 2, kind: input, shape index: {}]   ;;  %s1420_s3 = inlined_call_operand.vmem [shape: f32[32,32], index: 3, kind: input, shape index: {}]   ;;  %s1421_s4 = inlined_call_operand.vmem [shape: f32[1,32], index: 4, kind: input, shape index: {}]   ;;  %s1422_s5 = inlined_call_operand.vmem [shape: f32[2,256], index: 5, kind: output, shape index: {0}]   ;;  %s1423_s6 = inlined_call_operand.hbm [shape: f32[2,32], index: 6, kind: output, shape index: {1}]  }
   0x1   :  { %v25_v0 = vld [vmem:[%s1418_s1] sm:$0xff]  ;;  %v26_v1 = vld [vmem:[%s1418_s1 + $0x8] sm:$0xff]  ;;  %v27_v2 = vld [vmem:[%s1418_s1 + $0x10] sm:$0xff] }
   0x2   :  { %v1059_v3 = vpack.c.bf16 %v26_v1, %v25_v0  ;;  %v28_v4 = vld [vmem:[%s1418_s1 + $0x18] sm:$0xff]  ;;  %v23_v5 = vld [vmem:[%s1417_s0] sm:$0xff] }
   0x3   :  { %v1063_v6 = vpack.c.bf16 %v28_v4, %v27_v2  ;;  %968 = vmatprep.mubr.msk.f32.mxu0 %vm36_vm0, %v23_v5 }
   0x4   :  { %12 = vsyncpa [#allocation3], 0  ;;  %1060 = vmatprep.subr.bf16.mxu0 %v1059_v3  ;;  %v24_v7 = vld [vmem:[%s1417_s0 + $0x8] sm:$0xff]  ;;  %v118_v8 = vld [vmem:[%s1420_s3] sm:$0xff]  ;;  %v1179_v11 = vmov 0.0|0.0   ;;  %vm1180_vm1 = vmmov 0   ;;  %v300_v38 = vlaneseq }
   0x5   :  { %1062 = vmatpush3.bf16.msra.mxu0 %v1059_v3  ;;  %v119_v9 = vld [vmem:[%s1420_s3 + $0x8] sm:$0xff]  ;;  %v120_v10 = vld [vmem:[%s1420_s3 + $0x10] sm:$0xff]  ;;  %1067 = vmatprep.subr.bf16.mxu1 %v1179_v11  ;;  %v121_v13 = vld [vmem:[%s1420_s3 + $0x18] sm:$0xff]  ;;  %v1181_v14 = vmov 0.0   ;;  %vm136_vm2 = vcmask 1041409   ;;  %vm210_vm3 = vcmask 254976  }
   0x6   :  { %1064 = vmatprep.subr.bf16.mxu0 %v1063_v6  ;;  %v1252_v12 = vpack.c.bf16 %v119_v9, %v118_v8  ;;  %979 = vmatprep.mubr.msk.f32.mxu1 %vm1180_vm1, %v1181_v14  ;;  %v1263_v15 = vpack.c.bf16 %v121_v13, %v120_v10  ;;  %v902_v16 = vld [vmem:[%s1419_s2] ss:$0 sm:$0xff]  ;;  %v1182_v36 = vmov 1983009808   ;;  %v301_v40 = vshrl.u32 %v300_v38, 7  ;;  %s1184_s21 = smov 64  }
   0x7   :  { %v1292_v25 = vld [vmem:[%s1421_s4] ss:$0 sm:$0xff]  ;;  %v298_v37 = vunpack.c.l.s4 %v1182_v36  ;;  %s1183_s4 = smov 32   ;;  %vm307_vm4 = vcmask 517376   ;;  %vm405_vm5 = vcmask 779776   ;;  %s1185_s26 = smov 96  }
   0x8   :  { %1069 = vmatpush3.bf16.msra.mxu1 %v1252_v12  ;;  %vm503_vm6 = vcmask 1042176   ;;  %s1186_s9 = smov [#allocation2]  }
   0x9   :  { %1066 = vmatpush3.bf16.msra.mxu0 %v1063_v6  ;;  %1070 = vmatprep.subr.bf16.mxu1 %v1179_v11  ;;  %v299_v39 = vunpack.c.0.s8 %v298_v37  ;;  %s892_s1 = sshll.u32 %s1186_s9, 4  ;;  %s893_s1 = int_to_ptr.vmem [resolvable:$true] %s892_s1 }
   0xa   :  { %1073 = vmatprep.subr.bf16.mxu0 %v1179_v11  ;;  %s1155_s10 = scalar_lea.vmem %s893_s1, 32  ;;  %p1160_p1 = scmp.lt.s32.totalorder %s893_s1, %s893_s1 }
   0xb   :  { %v1309_v41 = vsub.s32 %v299_v39, %v301_v40  ;;  %p1156_p0 = scmp.ne.s32.totalorder %s893_s1, %s1155_s10  ;;  %p1161_p2 = scmp.lt.s32.totalorder %s1155_s10, %s1155_s10 }
   0xc   :  { %969 = vmatmul.mubr.msk.f32.vlgmr.msra.gmra.mrb[0].mxu0 %vm36_vm0, %v24_v7  ;;  %1072 = vmatpush3.bf16.msra.mxu1 %v1263_v15 }
   0xd   :  { %990 = vmatprep.mubr.msk.f32.mxu0 %vm1180_vm1, %v1181_v14  ;;  %1075 = vmatpush3.bf16.msra.mxu0 %v1252_v12  ;;  %p1162_p3 = por %p1161_p2, %p1160_p1 }
   0xe   :  { %1076 = vmatprep.subr.bf16.mxu0 %v1179_v11  ;;  %1079 = vmatprep.subr.bf16.mxu1 %v1179_v11 }
   0xf   :  { %p1163_p4 = pnand %p1162_p3, %p1156_p0 }
  0x11   :  { %1078 = vmatpush3.bf16.msra.mxu0 %v1263_v15 }
  0x12   :  { %1085 = vmatprep.subr.bf16.mxu0 %v1179_v11 }
  0xdf   :  { %v970_v17 = vpop.f32.mrb[0].mxu0 }
  0xe0   :  { %v1275_v18 = vadd.f32 %v970_v17, %v902_v16  ;;  %v109_v19 = vpop.f32.mrb[1].mxu0 }
  0xe1   :  { %v1277_v20 = vadd.f32 %v902_v16, %v109_v19 }
  0xe2   :  { %1123 = vtanh.f32 %v1275_v18 }
  0xe3   :  { %1125 = vtanh.f32 %v1277_v20 }
  0xec   :  { %v1124_v21 = vpop.eup %1123 }
  0xed   :  { %v1126_v22 = vpop.eup %1125  ;;  %v135_v23 = vrot.slane %v1124_v21, 7 }
  0xef   :  { %v137_v24 = vsel %vm136_vm2, %v135_v23, %v1126_v22 }
  0xf0   :  { %980 = vmatmul.mubr.msk.f32.vlgmr.msra.gmra.mrb[0].mxu1 %vm36_vm0, %v137_v24 }
  0xf1   :  { %1081 = vmatpush3.bf16.msra.mxu1 %v1252_v12  ;;  %1001 = vmatprep.mubr.msk.f32.mxu1 %vm1180_vm1, %v1181_v14 }
  0xf2   :  { %1082 = vmatprep.subr.bf16.mxu1 %v1179_v11 }
  0xf5   :  { %1084 = vmatpush3.bf16.msra.mxu1 %v1263_v15 }
  0xf6   :  { %1091 = vmatprep.subr.bf16.mxu1 %v1179_v11 }
 0x1c3   :  { %v206_v26 = vpop.f32.mrb[0].mxu1 }
 0x1c4   :  { %v207_v27 = vadd.f32 %v1292_v25, %v206_v26  ;;  %v981_v28 = vpop.f32.mrb[1].mxu1 }
 0x1c6   :  { %v213_v29 = vrot.slane %v207_v27, 7  ;;  %211 = vst.msk [vmem:[%s1422_s5] sm:$0x3] %vm210_vm3, %v207_v27  ;;  %v217_v31 = vadd.f32 %v207_v27, %v1275_v18 }
 0x1c8   :  { %v216_v30 = vadd.f32 %v213_v29, %v1277_v20 }
 0x1ca   :  { %1127 = vtanh.f32 %v216_v30 }
 0x1cb   :  { %1129 = vtanh.f32 %v217_v31 }
 0x1d4   :  { %v1128_v32 = vpop.eup %1127 }
 0x1d5   :  { %v222_v33 = vrot.slane %v1128_v32, 1  ;;  %v1130_v34 = vpop.eup %1129 }
 0x1d7   :  { %v223_v35 = vsel %vm136_vm2, %v1130_v34, %v222_v33 }
 0x1d8   :  { %991 = vmatmul.mubr.msk.f32.vlgmr.msra.gmra.mrb[2].mxu0 %vm36_vm0, %v223_v35 }
 0x1d9   :  { %1087 = vmatpush3.bf16.msra.mxu0 %v1252_v12  ;;  %1012 = vmatprep.mubr.msk.f32.mxu0 %vm1180_vm1, %v1181_v14 }
 0x1da   :  { %1088 = vmatprep.subr.bf16.mxu0 %v1179_v11 }
 0x1dd   :  { %1090 = vmatpush3.bf16.msra.mxu0 %v1263_v15 }
 0x1de   :  { %1097 = vmatprep.subr.bf16.mxu0 %v1179_v11 }
 0x2ab   :  { %v292_v42 = vpop.f32.mrb[2].mxu0 }
 0x2ac   :  { %v293_v43 = vadd.f32 %v1292_v25, %v292_v42  ;;  %v992_v44 = vpop.f32.mrb[3].mxu0 }
 0x2ae   :  { %v309_v45 = vrot.slane %v293_v43, 6  ;;  %v310_v46 = vrot.slane %v293_v43, 7  ;;  %v303_v47 = vrot.slane %v293_v43, %v1309_v41 }
 0x2b0   :  { %v313_v48 = vadd.f32 %v309_v45, %v1277_v20  ;;  %v314_v49 = vadd.f32 %v310_v46, %v1275_v18  ;;  %304 = vrot.lane.b32.xlu0 %v303_v47, %s1183_s4 }
 0x2b2   :  { %1131 = vtanh.f32 %v313_v48 }
 0x2b3   :  { %1133 = vtanh.f32 %v314_v49 }
 0x2bc   :  { %v1132_v50 = vpop.eup %1131 }
 0x2bd   :  { %v1134_v51 = vpop.eup %1133  ;;  %v319_v52 = vrot.slane %v1132_v50, 2 }
 0x2be   :  { %v320_v53 = vrot.slane %v1134_v51, 1 }
 0x2c0   :  { %v321_v54 = vsel %vm136_vm2, %v320_v53, %v319_v52 }
 0x2c1   :  { %1002 = vmatmul.mubr.msk.f32.vlgmr.msra.gmra.mrb[2].mxu1 %vm36_vm0, %v321_v54 }
 0x2c2   :  { %1093 = vmatpush3.bf16.msra.mxu1 %v1252_v12  ;;  %1023 = vmatprep.mubr.msk.f32.mxu1 %vm1180_vm1, %v1181_v14 }
 0x2c3   :  { %1094 = vmatprep.subr.bf16.mxu1 %v1179_v11 }
 0x2c6   :  { %1096 = vmatpush3.bf16.msra.mxu1 %v1263_v15 }
 0x2c7   :  { %1103 = vmatprep.subr.bf16.mxu1 %v1179_v11 }
 0x322   :  { %v305_v55 = vpop.permute.xlu0 %304 }
 0x323   :  { %308 = vst.msk [vmem:[%s1422_s5] sm:$0x3] %vm307_vm4, %v305_v55 }
 0x394   :  { %v390_v56 = vpop.f32.mrb[2].mxu1 }
 0x395   :  { %v391_v57 = vadd.f32 %v1292_v25, %v390_v56  ;;  %v1003_v58 = vpop.f32.mrb[3].mxu1 }
 0x397   :  { %v407_v59 = vrot.slane %v391_v57, 5  ;;  %v408_v60 = vrot.slane %v391_v57, 6  ;;  %v401_v61 = vrot.slane %v391_v57, %v1309_v41 }
 0x399   :  { %v411_v62 = vadd.f32 %v407_v59, %v1277_v20  ;;  %v412_v63 = vadd.f32 %v408_v60, %v1275_v18  ;;  %402 = vrot.lane.b32.xlu1 %v401_v61, %s1184_s21 }
 0x39b   :  { %1135 = vtanh.f32 %v411_v62 }
 0x39c   :  { %1137 = vtanh.f32 %v412_v63 }
 0x3a5   :  { %v1136_v0 = vpop.eup %1135 }
 0x3a6   :  { %v1138_v1 = vpop.eup %1137  ;;  %v417_v2 = vrot.slane %v1136_v0, 3 }
 0x3a7   :  { %v418_v3 = vrot.slane %v1138_v1, 2 }
 0x3a9   :  { %v419_v4 = vsel %vm136_vm2, %v418_v3, %v417_v2 }
 0x3aa   :  { %1013 = vmatmul.mubr.msk.f32.vlgmr.msra.gmra.mrb[4].mxu0 %vm36_vm0, %v419_v4 }
 0x3ab   :  { %1099 = vmatpush3.bf16.msra.mxu0 %v1252_v12  ;;  %1034 = vmatprep.mubr.msk.f32.mxu0 %vm1180_vm1, %v1181_v14 }
 0x3ac   :  { %1100 = vmatprep.subr.bf16.mxu0 %v1179_v11 }
 0x3af   :  { %1102 = vmatpush3.bf16.msra.mxu0 %v1263_v15 }
 0x3b0   :  { %1109 = vmatprep.subr.bf16.mxu0 %v1179_v11 }
 0x40b   :  { %v403_v5 = vpop.permute.xlu1 %402 }
 0x40c   :  { %406 = vst.msk [vmem:[%s1422_s5] sm:$0x3] %vm405_vm5, %v403_v5 }
 0x47d   :  { %v488_v6 = vpop.f32.mrb[4].mxu0 }
 0x47e   :  { %v489_v7 = vadd.f32 %v1292_v25, %v488_v6  ;;  %v1014_v8 = vpop.f32.mrb[5].mxu0 }
 0x480   :  { %v505_v9 = vrot.slane %v489_v7, 4  ;;  %v506_v10 = vrot.slane %v489_v7, 5 }
 0x482   :  { %v509_v13 = vadd.f32 %v505_v9, %v1277_v20  ;;  %v510_v16 = vadd.f32 %v506_v10, %v1275_v18 }
 0x484   :  { %1139 = vtanh.f32 %v509_v13 }
 0x485   :  { %1141 = vtanh.f32 %v510_v16 }
 0x48e   :  { %v1140_v17 = vpop.eup %1139 }
 0x48f   :  { %v1142_v19 = vpop.eup %1141  ;;  %v515_v21 = vrot.slane %v1140_v17, 4 }
 0x490   :  { %v516_v22 = vrot.slane %v1142_v19, 3 }
 0x492   :  { %v517_v23 = vsel %vm136_vm2, %v516_v22, %v515_v21 }
 0x493   :  { %1024 = vmatmul.mubr.msk.f32.vlgmr.msra.gmra.mrb[4].mxu1 %vm36_vm0, %v517_v23 }
 0x494   :  { %1105 = vmatpush3.bf16.msra.mxu1 %v1252_v12  ;;  %1045 = vmatprep.mubr.msk.f32.mxu1 %vm1180_vm1, %v1181_v14 }
 0x495   :  { %1106 = vmatprep.subr.bf16.mxu1 %v1179_v11 }
 0x498   :  { %1108 = vmatpush3.bf16.msra.mxu1 %v1263_v15 }
 0x566   :  { %v586_v24 = vpop.f32.mrb[4].mxu1 }
 0x567   :  { %v587_v26 = vadd.f32 %v1292_v25, %v586_v24  ;;  %v1025_v27 = vpop.f32.mrb[5].mxu1 }
 0x569   :  { %v592_v28 = vrot.slane %v587_v26, 3  ;;  %v593_v29 = vrot.slane %v587_v26, 4  ;;  %590 = vst.msk [vmem:[%s1422_s5 + $0x2] sm:$0x3] %vm210_vm3, %v587_v26 }
 0x56b   :  { %v596_v30 = vadd.f32 %v592_v28, %v1277_v20  ;;  %v597_v31 = vadd.f32 %v593_v29, %v1275_v18 }
 0x56d   :  { %1143 = vtanh.f32 %v596_v30 }
 0x56e   :  { %1145 = vtanh.f32 %v597_v31 }
 0x577   :  { %v1144_v32 = vpop.eup %1143 }
 0x578   :  { %v1146_v33 = vpop.eup %1145  ;;  %v602_v34 = vrot.slane %v1144_v32, 5 }
 0x579   :  { %v603_v35 = vrot.slane %v1146_v33, 4 }
 0x57b   :  { %v604_v36 = vsel %vm136_vm2, %v603_v35, %v602_v34 }
 0x57c   :  { %1035 = vmatmul.mubr.msk.f32.vlgmr.msra.gmra.mrb[6].mxu0 %vm36_vm0, %v604_v36 }
 0x57d   :  { %1111 = vmatpush3.bf16.msra.mxu0 %v1252_v12  ;;  %1056 = vmatprep.mubr.msk.f32.mxu0 %vm1180_vm1, %v1181_v14  ;;  %v499_v12 = vrot.slane %v489_v7, %v1309_v41 }
 0x57e   :  { %1112 = vmatprep.subr.bf16.mxu0 %v1179_v11 }
 0x581   :  { %1114 = vmatpush3.bf16.msra.mxu0 %v1263_v15 }
 0x64f   :  { %v673_v37 = vpop.f32.mrb[6].mxu0 }
 0x650   :  { %v674_v38 = vadd.f32 %v1292_v25, %v673_v37  ;;  %v1036_v39 = vpop.f32.mrb[7].mxu0 }
 0x652   :  { %v689_v40 = vrot.slane %v674_v38, 2  ;;  %v690_v42 = vrot.slane %v674_v38, 3  ;;  %v684_v43 = vrot.slane %v674_v38, %v1309_v41 }
 0x654   :  { %v693_v44 = vadd.f32 %v689_v40, %v1277_v20  ;;  %v694_v45 = vadd.f32 %v690_v42, %v1275_v18  ;;  %685 = vrot.lane.b32.xlu0 %v684_v43, %s1183_s4 }
 0x656   :  { %1147 = vtanh.f32 %v693_v44 }
 0x657   :  { %1149 = vtanh.f32 %v694_v45 }
 0x658   :  { %500 = vrot.lane.b32.xlu0 %v499_v12, %s1185_s26 }
 0x660   :  { %v1148_v11 = vpop.eup %1147 }
 0x661   :  { %v1150_v14 = vpop.eup %1149  ;;  %v699_v15 = vrot.slane %v1148_v11, 6 }
 0x662   :  { %v700_v46 = vrot.slane %v1150_v14, 5 }
 0x664   :  { %v701_v47 = vsel %vm136_vm2, %v700_v46, %v699_v15 }
 0x665   :  { %1046 = vmatmul.mubr.msk.f32.vlgmr.msra.gmra.mrb[6].mxu1 %vm36_vm0, %v701_v47 }
 0x6c6   :  { %v686_v48 = vpop.permute.xlu0 %685 }
 0x6c7   :  { %688 = vst.msk [vmem:[%s1422_s5 + $0x2] sm:$0x3] %vm307_vm4, %v686_v48 }
 0x6ca   :  { %v501_v49 = vpop.permute.xlu0 %500 }
 0x6cb   :  { %504 = vst.msk [vmem:[%s1422_s5] sm:$0x3] %vm503_vm6, %v501_v49 }
 0x738   :  { %v770_v50 = vpop.f32.mrb[6].mxu1 }
 0x739   :  { %v771_v51 = vadd.f32 %v1292_v25, %v770_v50  ;;  %v1047_v52 = vpop.f32.mrb[7].mxu1 }
 0x73b   :  { %v786_v53 = vrot.slane %v771_v51, 1  ;;  %v787_v54 = vrot.slane %v771_v51, 2  ;;  %v781_v55 = vrot.slane %v771_v51, %v1309_v41 }
 0x73d   :  { %v790_v56 = vadd.f32 %v786_v53, %v1277_v20  ;;  %v791_v57 = vadd.f32 %v787_v54, %v1275_v18  ;;  %782 = vrot.lane.b32.xlu1 %v781_v55, %s1184_s21 }
 0x73f   :  { %1151 = vtanh.f32 %v790_v56 }
 0x740   :  { %1153 = vtanh.f32 %v791_v57 }
 0x749   :  { %v1152_v58 = vpop.eup %1151 }
 0x74a   :  { %v1154_v59 = vpop.eup %1153  ;;  %v796_v60 = vrot.slane %v1152_v58, 7 }
 0x74b   :  { %v797_v61 = vrot.slane %v1154_v59, 6 }
 0x74d   :  { %v798_v62 = vsel %vm136_vm2, %v797_v61, %v796_v60 }
 0x74e   :  { %1057 = vmatmul.mubr.msk.f32.vlgmr.msra.gmra.mrb[8].mxu0 %vm36_vm0, %v798_v62 }
 0x7af   :  { %v783_v63 = vpop.permute.xlu1 %782 }
 0x7b0   :  { %785 = vst.msk [vmem:[%s1422_s5 + $0x2] sm:$0x3] %vm405_vm5, %v783_v63 }
 0x821   :  { %v867_v18 = vpop.f32.mrb[8].mxu0 }
 0x822   :  { %v868_v20 = vadd.f32 %v1292_v25, %v867_v18  ;;  %v1058_v0 = vpop.f32.mrb[9].mxu0 }
 0x824   :  { %v878_v1 = vrot.slane %v868_v20, %v1309_v41  ;;  %883 = vst.msk [vmem:[#allocation2] sm:$0x3] %vm210_vm3, %v868_v20 }
 0x825   :  { %1166 = shalt.err (!%p1163_p4)
}
 0x826   :  { %s1167_s13 = scalar_lea.hbm %s1423_s6, 32 }
 0x827   :  { %p1168_p5 = scmp.ne.s32.totalorder %s1423_s6, %s1167_s13  ;;  %p1171_p6 = scmp.lt.u32.totalorder %s1167_s13, %s1423_s6 }
 0x829   :  { %p1173_p7 = pnand %p1171_p6, %p1168_p5 }
 0x82b   :  { %1176 = shalt.err (!%p1173_p7)
}
 0x82c   :  { %895 = dma.vmem_to_hbm [thread:$0]  %s893_s1, 32, %s1423_s6, [#allocation3]   ;;  %879 = vrot.lane.b32.xlu1 %v878_v1, %s1185_s26 }
 0x89e   :  { %v880_v25 = vpop.permute.xlu1 %879 }
 0x89f   :  { %882 = vst.msk [vmem:[%s1422_s5 + $0x2] sm:$0x3] %vm503_vm6, %v880_v25 }
 0x8a0   :  { %1177 = dma.done.wait [#allocation3], 32  }
 0x8a1   :  { %1178 = vsyncadd [#allocation3], 4294967264 }
 0x8a2   :  { %901 = vsyncpa [#allocation3], 1 }

</bundles_post_ra>
